<compile_context>
chip_gen: v7x
topology: tpu7x:2x2x1
jax: 0.10.0
libtpu: 0.0.40
codegen_flags: <defaults>
</compile_context>

<pallas_src>
import functools

import jax
import jax.numpy as jnp
from jax.experimental import pallas as pl
from jax.experimental.pallas import tpu as pltpu

EPS = 1e-5

# Conservative per-grid-step VMEM budget: fits the default scoped-VMEM limit on
# v5e (16 MiB) as well as v6e / v7x (32 MiB) without an override.
_VMEM_BUDGET_BYTES = 12 * 1024 * 1024
# Target block size when batch-blocking small (C, L) slabs.
_BLOCK_TARGET_BYTES = 2 * 1024 * 1024


def _patch_embed_ln_kernel(x_ref, gamma_ref, beta_ref, o_ref, *, inv_c):
    # x_ref:     (tB, Cp, tL)   native dtype (channel padding, if any, is zero)
    # gamma_ref: (1, 1, Cp)     float32
    # beta_ref:  (1, 1, Cp)     float32
    # o_ref:     (tB, tL, Cp)   lane-dense output block
    x = x_ref[...].astype(jnp.float32)

    # Single-pass LayerNorm statistics over the channel axis (sublane reduce).
    # Zero-padded channels do not perturb the sums; divide by the real C.
    s1 = jnp.sum(x, axis=1, keepdims=True)           # (tB, 1, tL)
    s2 = jnp.sum(x * x, axis=1, keepdims=True)       # (tB, 1, tL)
    mean = s1 * inv_c
    var = s2 * inv_c - mean * mean
    inv = jax.lax.rsqrt(var + EPS)
    y = (x - mean) * inv                              # (tB, Cp, tL) f32

    # One transpose per block into the lane-dense (tL, Cp) layout, then the
    # per-channel affine as rows (sublane broadcast, nearly free vs. the old
    # (C, 1) lane-broadcast columns).
    # TODO(synk): on v7x, if the XLU transpose becomes co-critical and the
    # output dtype is bf16, this transpose could be offloaded to the idle MXU
    # via an identity dot_general.
    y_t = jnp.swapaxes(y, 1, 2)                       # (tB, tL, Cp) f32
    o_ref[...] = (y_t * gamma_ref[...] + beta_ref[...]).astype(o_ref.dtype)


def _block_spec(shape, index_map, buffer_count=None):
    """BlockSpec, optionally with deeper pipelining; graceful fallback if the
    installed jax does not expose BlockSpec.pipeline_mode / pl.Buffered."""
    if buffer_count is not None:
        try:
            return pl.BlockSpec(shape, index_map,
                                pipeline_mode=pl.Buffered(buffer_count))
        except (TypeError, AttributeError):
            pass
    return pl.BlockSpec(shape, index_map)


def _pick_tiles(B, C, L, itemsize):
    """Choose (tB, tL) batch/token tiles under the per-step VMEM budget."""
    # Per-element VMEM per grid step: double-buffered input + output blocks
    # plus ~3 full-size f32 temporaries inside the kernel body.
    bytes_per_elem = 4 * itemsize + 3 * 4
    max_block_elems = max(1, _VMEM_BUDGET_BYTES // bytes_per_elem)

    # Token tiling: largest lane-aligned tile that divides L and fits the
    # budget; if nothing fits, fall back to the smallest aligned tile.
    tL = L
    if L % 128 == 0 and L > 128:
        fitting = [c for c in (2048, 1024, 512, 256, 128) if L % c == 0]
        chosen = None
        for cand in fitting:
            if C * cand <= max_block_elems:
                chosen = cand
                break
        if chosen is None and fitting:
            chosen = fitting[-1]      # wrapper raises vmem_limit if needed
        if chosen is not None:
            tL = chosen

    # Batch blocking: if one block covers the whole token axis and is small,
    # pack several batch rows per block (~1-2 MiB) to amortize the fixed
    # per-step overhead.
    tB = 1
    if tL == L and C * L <= max_block_elems:
        target_elems = min(max_block_elems, _BLOCK_TARGET_BYTES // itemsize)
        cap = max(1, min(B, target_elems // (C * L)))
        for cand in range(cap, 0, -1):
            if B % cand == 0:
                tB = cand
                break
    return tB, tL


def patch_embed(x_nchw, gamma, beta):
    """(B, C, H, W) -> (B, H*W, C), with LayerNorm over the channel dim."""
    B, C, H, W = x_nchw.shape
    L = H * W
    x = x_nchw.reshape(B, C, L)                       # glue reshape, no compute

    # Lane-density guard: pad embed_dim to a multiple of 128 so every output
    # store is an unmasked full-lane vst (stats use the real C; the pad is
    # sliced off afterwards). Lane-dense configs like SiT-S (C=384) skip this.
    Cp = ((C + 127) // 128) * 128
    gamma_f = jnp.asarray(gamma, jnp.float32)
    beta_f = jnp.asarray(beta, jnp.float32)
    if Cp != C:
        x = jnp.pad(x, ((0, 0), (0, Cp - C), (0, 0)))
        gamma_f = jnp.pad(gamma_f, (0, Cp - C))
        beta_f = jnp.pad(beta_f, (0, Cp - C))
    gamma_row = gamma_f.reshape(1, 1, Cp)
    beta_row = beta_f.reshape(1, 1, Cp)

    itemsize = jnp.dtype(x_nchw.dtype).itemsize
    tB, tL = _pick_tiles(B, Cp, L, itemsize)
    n_b, n_l = B // tB, L // tL

    # Input spec: 3-deep pipelining when the token axis is tiled (the
    # (tB, Cp, tL) slice is a strided DMA with lower effective bandwidth).
    x_spec = _block_spec((tB, Cp, tL), lambda b, l: (b, 0, l),
                         buffer_count=3 if tL < L else None)

    # Generation-aware VMEM budget: the tile picker keeps normal paths under
    # the default scoped-VMEM limit on v5e/v6e/v7x; only the degenerate
    # full-L fallback (L not a multiple of 128 with huge C*L) needs a raise.
    est_step_bytes = tB * Cp * tL * (4 * itemsize + 12) + (1 << 20)
    cp_kwargs = dict(dimension_semantics=("parallel", "parallel"))
    if est_step_bytes > 14 * 1024 * 1024:
        cp_kwargs["vmem_limit_bytes"] = int(min(est_step_bytes,
                                                56 * 1024 * 1024))

    cost = pl.CostEstimate(
        flops=9 * B * L * Cp,
        transcendentals=B * L,
        bytes_accessed=2 * B * L * Cp * itemsize,
    )

    kernel = functools.partial(_patch_embed_ln_kernel, inv_c=1.0 / C)

    out = pl.pallas_call(
        kernel,
        out_shape=jax.ShapeDtypeStruct((B, L, Cp), x_nchw.dtype),
        grid_spec=pltpu.PrefetchScalarGridSpec(
            num_scalar_prefetch=0,
            grid=(n_b, n_l),
            in_specs=[
                x_spec,
                pl.BlockSpec((1, 1, Cp), lambda b, l: (0, 0, 0)),
                pl.BlockSpec((1, 1, Cp), lambda b, l: (0, 0, 0)),
            ],
            out_specs=pl.BlockSpec((tB, tL, Cp), lambda b, l: (b, l, 0)),
        ),
        compiler_params=pltpu.CompilerParams(**cp_kwargs),
        cost_estimate=cost,
    )(x, gamma_row, beta_row)

    if Cp != C:
        out = out[:, :, :C]
    return out


def _reference(x_nchw, gamma, beta):
    B, C, H, W = x_nchw.shape
    x = x_nchw.reshape(B, C, H * W).transpose(0, 2, 1).astype(jnp.float32)
    mean = jnp.mean(x, axis=-1, keepdims=True)
    var = jnp.mean((x - mean) ** 2, axis=-1, keepdims=True)
    y = (x - mean) * jax.lax.rsqrt(var + EPS)
    return (y * gamma + beta).astype(x_nchw.dtype)


if __name__ == "__main__":
    key = jax.random.PRNGKey(0)
    kx, kg, kb, kx2, kg2, kb2 = jax.random.split(key, 6)

    # 1) Small shape consistent with the module (the forward expects the
    #    channel dim to already equal embed_dim — there is no projection conv).
    #    Exercises the C-padding guard and the batch-blocking path.
    B, embed_dim, H, W = 2, 32, 16, 16
    x = jax.random.normal(kx, (B, embed_dim, H, W), dtype=jnp.float32)
    gamma = 1.0 + 0.1 * jax.random.normal(kg, (embed_dim,), dtype=jnp.float32)
    beta = 0.1 * jax.random.normal(kb, (embed_dim,), dtype=jnp.float32)

    out = jax.block_until_ready(patch_embed(x, gamma, beta))
    ref = _reference(x, gamma, beta)
    assert out.shape == (B, H * W, embed_dim)
    assert jnp.allclose(out, ref, atol=1e-4, rtol=1e-4)

    # 2) Lane-dense shape exercising the token-tiled path (tL < L).
    B2, C2, H2, W2 = 2, 128, 64, 64
    x2 = jax.random.normal(kx2, (B2, C2, H2, W2), dtype=jnp.float32)
    gamma2 = 1.0 + 0.1 * jax.random.normal(kg2, (C2,), dtype=jnp.float32)
    beta2 = 0.1 * jax.random.normal(kb2, (C2,), dtype=jnp.float32)

    out2 = jax.block_until_ready(patch_embed(x2, gamma2, beta2))
    ref2 = _reference(x2, gamma2, beta2)
    assert out2.shape == (B2, H2 * W2, C2)
    assert jnp.allclose(out2, ref2, atol=1e-4, rtol=1e-4)

    print("KERNEL_OK")
</pallas_src>

<mosaic_0001>
module attributes {stable_mosaic.version = 11 : i64} {
  func.func @_patch_embed_ln_kernel(%arg0: i32, %arg1: i32, %arg2: memref<2x128x256xf32, #tpu.memory_space<vmem>>, %arg3: memref<1x1x128xf32, #tpu.memory_space<vmem>>, %arg4: memref<1x1x128xf32, #tpu.memory_space<vmem>>, %arg5: memref<2x256x128xf32, #tpu.memory_space<vmem>>) attributes {dimension_semantics = [#tpu.dimension_semantics<parallel>, #tpu.dimension_semantics<parallel>], iteration_bounds = array<i64: 1, 1>, scalar_prefetch = 0 : i64, scratch_operands = 0 : i64, tpu.core_type = #tpu.core_type<tc>, window_params = [{transform_indices = @transform_0, window_bounds = array<i64: 2, 128, 256>}, {pipeline_mode = #tpu.pipeline_mode<synchronous>, transform_indices = @transform_1, window_bounds = array<i64: 1, 1, 128>}, {pipeline_mode = #tpu.pipeline_mode<synchronous>, transform_indices = @transform_2, window_bounds = array<i64: 1, 1, 128>}, {transform_indices = @transform_3, window_bounds = array<i64: 2, 256, 128>}]} {
    %c0 = arith.constant 0 : index
    %c0_0 = arith.constant 0 : index
    %c0_1 = arith.constant 0 : index
    %0 = vector.load %arg2[%c0, %c0_0, %c0_1] : memref<2x128x256xf32, #tpu.memory_space<vmem>>, vector<2x128x256xf32>
    %cst = arith.constant dense<0.000000e+00> : vector<2x256xf32>
    %1 = vector.multi_reduction <add>, %0, %cst [1] : vector<2x128x256xf32> to vector<2x256xf32>
    %2 = vector.shape_cast %1 : vector<2x256xf32> to vector<2x1x256xf32>
    %3 = arith.mulf %0, %0 : vector<2x128x256xf32>
    %cst_2 = arith.constant dense<0.000000e+00> : vector<2x256xf32>
    %4 = vector.multi_reduction <add>, %3, %cst_2 [1] : vector<2x128x256xf32> to vector<2x256xf32>
    %5 = vector.shape_cast %4 : vector<2x256xf32> to vector<2x1x256xf32>
    %cst_3 = arith.constant 3.125000e-02 : f32
    %6 = vector.broadcast %cst_3 : f32 to vector<2x1x256xf32>
    %7 = arith.mulf %2, %6 : vector<2x1x256xf32>
    %cst_4 = arith.constant 3.125000e-02 : f32
    %8 = vector.broadcast %cst_4 : f32 to vector<2x1x256xf32>
    %9 = arith.mulf %5, %8 : vector<2x1x256xf32>
    %10 = arith.mulf %7, %7 : vector<2x1x256xf32>
    %11 = arith.subf %9, %10 : vector<2x1x256xf32>
    %cst_5 = arith.constant 9.99999974E-6 : f32
    %12 = vector.broadcast %cst_5 : f32 to vector<2x1x256xf32>
    %13 = arith.addf %11, %12 : vector<2x1x256xf32>
    %14 = math.rsqrt %13 : vector<2x1x256xf32>
    %15 = vector.broadcast %7 : vector<2x1x256xf32> to vector<2x128x256xf32>
    %16 = arith.subf %0, %15 : vector<2x128x256xf32>
    %17 = vector.broadcast %14 : vector<2x1x256xf32> to vector<2x128x256xf32>
    %18 = arith.mulf %16, %17 : vector<2x128x256xf32>
    %19 = tpu.transpose %18, [0, 2, 1] : vector<2x128x256xf32> -> vector<2x256x128xf32>
    %c0_6 = arith.constant 0 : index
    %c0_7 = arith.constant 0 : index
    %c0_8 = arith.constant 0 : index
    %20 = vector.load %arg3[%c0_6, %c0_7, %c0_8] : memref<1x1x128xf32, #tpu.memory_space<vmem>>, vector<1x1x128xf32>
    %21 = vector.broadcast %20 : vector<1x1x128xf32> to vector<2x256x128xf32>
    %22 = arith.mulf %19, %21 : vector<2x256x128xf32>
    %c0_9 = arith.constant 0 : index
    %c0_10 = arith.constant 0 : index
    %c0_11 = arith.constant 0 : index
    %23 = vector.load %arg4[%c0_9, %c0_10, %c0_11] : memref<1x1x128xf32, #tpu.memory_space<vmem>>, vector<1x1x128xf32>
    %24 = vector.broadcast %23 : vector<1x1x128xf32> to vector<2x256x128xf32>
    %25 = arith.addf %22, %24 : vector<2x256x128xf32>
    %c0_12 = arith.constant 0 : index
    %c0_13 = arith.constant 0 : index
    %c0_14 = arith.constant 0 : index
    %26 = vector.load %arg5[%c0_12, %c0_13, %c0_14] : memref<2x256x128xf32, #tpu.memory_space<vmem>>, vector<2x256x128xf32>
    tpu.vector_store %arg5[%c0_12, %c0_13, %c0_14], %25 {strides = array<i32>} : memref<2x256x128xf32, #tpu.memory_space<vmem>>, vector<2x256x128xf32>,
    return
  }
  func.func @transform_0(%arg0: i32, %arg1: i32) -> (i32, i32, i32) {
    %c0_i32 = arith.constant 0 : i32
    %c0_i32_0 = arith.constant 0 : i32
    return %arg0, %c0_i32, %arg1 : i32, i32, i32
  }
  func.func @transform_1(%arg0: i32, %arg1: i32) -> (i32, i32, i32) {
    %c0_i32 = arith.constant 0 : i32
    %c0_i32_0 = arith.constant 0 : i32
    %c0_i32_1 = arith.constant 0 : i32
    %c0_i32_2 = arith.constant 0 : i32
    return %c0_i32, %c0_i32_0, %c0_i32_1 : i32, i32, i32
  }
  func.func @transform_2(%arg0: i32, %arg1: i32) -> (i32, i32, i32) {
    %c0_i32 = arith.constant 0 : i32
    %c0_i32_0 = arith.constant 0 : i32
    %c0_i32_1 = arith.constant 0 : i32
    %c0_i32_2 = arith.constant 0 : i32
    return %c0_i32, %c0_i32_0, %c0_i32_1 : i32, i32, i32
  }
  func.func @transform_3(%arg0: i32, %arg1: i32) -> (i32, i32, i32) {
    %c0_i32 = arith.constant 0 : i32
    %c0_i32_0 = arith.constant 0 : i32
    return %arg0, %arg1, %c0_i32 : i32, i32, i32
  }
}

</mosaic_0001>

<bundles_post_ra>
// kernel: tpu_custom_call.1
= control target key start
LH: loop header
LB: loop body
LE: loop exit
PB: predicated region body
PF: predicated region fallthrough
CT: control target
= control target key end

     0   :  { %8 = vsyncpa [#allocation3], 0  ;;  %s1694_s0 = inlined_call_operand.hbm [shape: f32[2,128,256], index: 0, kind: input, shape index: {}]   ;;  %s1695_s1 = inlined_call_operand.vmem [shape: f32[1,1,128], index: 1, kind: input, shape index: {}]   ;;  %s1696_s2 = inlined_call_operand.vmem [shape: f32[1,1,128], index: 2, kind: input, shape index: {}]   ;;  %s1697_s3 = inlined_call_operand.hbm [shape: f32[2,256,128], index: 3, kind: output, shape index: {}]  }
   0x1   :  { %9 = vsyncpa [#allocation4], 0  ;;  %s892_s12 = smov [#allocation2]   ;;  %s844_s16 = scalar_lea.hbm %s1694_s0, 8192 }
   0x2   :  { %s15_s13 = sshll.u32 %s892_s12, 4  ;;  %p845_p0 = scmp.ne.s32.totalorder %s1694_s0, %s844_s16  ;;  %s16_s13 = int_to_ptr.vmem [resolvable:$true] %s15_s13 }
   0x3   :  { %p848_p1 = scmp.lt.u32.totalorder %s844_s16, %s1694_s0 }
   0x5   :  { %p850_p2 = pnand %p848_p1, %p845_p0 }
   0x7   :  { %853 = shalt.err (!%p850_p2)
}
   0x8   :  { %s854_s21 = scalar_lea.vmem %s16_s13, 8192  ;;  %p859_p4 = scmp.lt.s32.totalorder %s16_s13, %s16_s13 }
   0x9   :  { %p855_p3 = scmp.ne.s32.totalorder %s16_s13, %s854_s21  ;;  %p860_p5 = scmp.lt.s32.totalorder %s854_s21, %s854_s21 }
   0xb   :  { %p861_p6 = por %p860_p5, %p859_p4 }
   0xd   :  { %p862_p7 = pnand %p861_p6, %p855_p3 }
   0xf   :  { %865 = shalt.err (!%p862_p7)
}
  0x10   :  { %s893_s22 = smov 256   ;;  %s894_s23 = smov 16  }
  0x11   :  { %21 = dma.hbm_to_vmem [thread:$0]  %s1694_s0, 8192, %s16_s13, [#allocation3], %s893_s22, %s893_s22, %s894_s23  }
  0x12   :  { %888 = dma.done.wait [#allocation3], 8192  }
  0x13   :  { %889 = vsyncadd [#allocation3], 4294959104  ;;  %v930_v0 = vld [vmem:[#allocation2 + $0x8] sm:$0xff]  ;;  %v932_v1 = vld [vmem:[#allocation2 + $0x18] sm:$0xff] }
  0x14   :  { %v934_v2 = vld [vmem:[#allocation2 + $0x28] sm:$0xff]  ;;  %v936_v3 = vld [vmem:[#allocation2 + $0x38] sm:$0xff]  ;;  %v114_v4 = vadd.f32 %v932_v1, %v930_v0  ;;  %v178_v5 = vmul.f32 %v930_v0, %v930_v0  ;;  %v180_v6 = vmul.f32 %v932_v1, %v932_v1  ;;  %v956_v15 = vld [vmem:[#allocation2] sm:$0xff] }
  0x15   :  { %v182_v7 = vmul.f32 %v934_v2, %v934_v2  ;;  %v946_v8 = vld [vmem:[#allocation2 + $0x48] sm:$0xff]  ;;  %v949_v10 = vld [vmem:[#allocation2 + $0x58] sm:$0xff]  ;;  %v184_v11 = vmul.f32 %v936_v3, %v936_v3  ;;  %v958_v16 = vld [vmem:[#allocation2 + $0x10] sm:$0xff]  ;;  %v177_v37 = vmul.f32 %v956_v15, %v956_v15 }
  0x16   :  { %v115_v9 = vadd.f32 %v114_v4, %v934_v2  ;;  %v262_v12 = vadd.f32 %v180_v6, %v178_v5  ;;  %v953_v13 = vld [vmem:[#allocation2 + $0x68] sm:$0xff]  ;;  %v960_v17 = vld [vmem:[#allocation2 + $0x78] sm:$0xff]  ;;  %v186_v18 = vmul.f32 %v946_v8, %v946_v8  ;;  %v964_v20 = vld [vmem:[#allocation2 + $0x20] sm:$0xff]  ;;  %v93_v21 = vadd.f32 %v958_v16, %v956_v15 }
  0x17   :  { %v968_v22 = vld [vmem:[#allocation2 + $0x88] sm:$0xff]  ;;  %v970_v23 = vld [vmem:[#allocation2 + $0x98] sm:$0xff]  ;;  %v973_v25 = vld [vmem:[#allocation2 + $0x30] sm:$0xff]  ;;  %v188_v28 = vmul.f32 %v949_v10, %v949_v10  ;;  %v190_v29 = vmul.f32 %v953_v13, %v953_v13  ;;  %v192_v35 = vmul.f32 %v960_v17, %v960_v17  ;;  %v179_v38 = vmul.f32 %v958_v16, %v958_v16 }
  0x18   :  { %v116_v14 = vadd.f32 %v115_v9, %v936_v3  ;;  %v263_v19 = vadd.f32 %v262_v12, %v182_v7  ;;  %1721 = vst [vmem:[#allocation8_spill] sm:$0xff] %v970_v23  ;;  %v975_v26 = vld [vmem:[#allocation2 + $0xa8] sm:$0xff]  ;;  %v977_v27 = vld [vmem:[#allocation2 + $0xb8] sm:$0xff]  ;;  %v94_v31 = vadd.f32 %v93_v21, %v964_v20  ;;  %v991_v36 = vld [vmem:[#allocation2 + $0x40] sm:$0xff]  ;;  %v194_v40 = vmul.f32 %v968_v22, %v968_v22 }
  0x19   :  { %1722 = vst [vmem:[#allocation9_spill] sm:$0xff] %v975_v26  ;;  %1723 = vst [vmem:[#allocation10_spill] sm:$0xff] %v977_v27  ;;  %v984_v32 = vld [vmem:[#allocation2 + $0xc8] sm:$0xff]  ;;  %v986_v33 = vld [vmem:[#allocation2 + $0xd8] sm:$0xff]  ;;  %v196_v41 = vmul.f32 %v970_v23, %v970_v23  ;;  %v198_v47 = vmul.f32 %v975_v26, %v975_v26  ;;  %v1013_v48 = vmul.f32 %v977_v27, %v977_v27 }
  0x1a   :  { %v117_v24 = vadd.f32 %v116_v14, %v946_v8  ;;  %v264_v30 = vadd.f32 %v263_v19, %v184_v11  ;;  %v997_v39 = vld [vmem:[#allocation2 + $0xe8] sm:$0xff]  ;;  %v95_v43 = vadd.f32 %v94_v31, %v973_v25  ;;  %v1006_v45 = vld [vmem:[#allocation2 + $0xf8] sm:$0xff]  ;;  %v1015_v49 = vld [vmem:[#allocation2 + $0x50] sm:$0xff]  ;;  %v181_v50 = vmul.f32 %v964_v20, %v964_v20 }
  0x1b   :  { %v1004_v44 = vld [vmem:[#allocation2 + $0x108] sm:$0xff]  ;;  %v1019_v51 = vld [vmem:[#allocation2 + $0x118] sm:$0xff]  ;;  %v1023_v52 = vmul.f32 %v984_v32, %v984_v32  ;;  %v1027_v53 = vmul.f32 %v986_v33, %v986_v33  ;;  %v1033_v58 = vld [vmem:[#allocation2 + $0x60] sm:$0xff]  ;;  %v183_v59 = vmul.f32 %v973_v25, %v973_v25  ;;  %v241_v60 = vadd.f32 %v179_v38, %v177_v37 }
  0x1c   :  { %v118_v34 = vadd.f32 %v117_v24, %v949_v10  ;;  %v265_v42 = vadd.f32 %v264_v30, %v186_v18  ;;  %1724 = vst [vmem:[#allocation11_spill] sm:$0xff] %v1004_v44  ;;  %1725 = vst [vmem:[#allocation12_spill] sm:$0xff] %v1019_v51  ;;  %v96_v55 = vadd.f32 %v95_v43, %v991_v36  ;;  %v1030_v56 = vld [vmem:[#allocation2 + $0x128] sm:$0xff]  ;;  %v1047_v5 = vld [vmem:[#allocation2 + $0x70] sm:$0xff] }
  0x1d   :  { %1726 = vst [vmem:[#allocation13_spill] sm:$0xff] %v1030_v56  ;;  %v156_v61 = vadd.f32 %v1019_v51, %v1004_v44  ;;  %v1041_v62 = vmul.f32 %v997_v39, %v997_v39  ;;  %v1045_v63 = vmul.f32 %v1006_v45, %v1006_v45  ;;  %1727 = vst [vmem:[#allocation14_spill] sm:$0xff] %v1047_v5  ;;  %v1050_v7 = vld [vmem:[#allocation2 + $0x138] sm:$0xff]  ;;  %v1053_v11 = vld [vmem:[#allocation2 + $0x80] sm:$0xff] }
  0x1e   :  { %v119_v46 = vadd.f32 %v118_v34, %v953_v13  ;;  %v266_v54 = vadd.f32 %v265_v42, %v188_v28  ;;  %v97_v6 = vadd.f32 %v96_v55, %v1015_v49  ;;  %1728 = vst [vmem:[#allocation15_spill] sm:$0xff] %v1050_v7  ;;  %1729 = vst [vmem:[#allocation16_spill] sm:$0xff] %v1053_v11  ;;  %v1055_v12 = vld [vmem:[#allocation2 + $0x90] sm:$0xff]  ;;  %v1060_v24 = vld [vmem:[#allocation2 + $0xa0] sm:$0xff] }
  0x1f   :  { %1730 = vst [vmem:[#allocation17_spill] sm:$0xff] %v1055_v12  ;;  %v185_v14 = vmul.f32 %v991_v36, %v991_v36  ;;  %v242_v18 = vadd.f32 %v241_v60, %v181_v50  ;;  %v157_v19 = vadd.f32 %v156_v61, %v1030_v56  ;;  %1731 = vst [vmem:[#allocation18_spill] sm:$0xff] %v1060_v24  ;;  %v1067_v31 = vld [vmem:[#allocation2 + $0x148] sm:$0xff]  ;;  %v1073_v43 = vld [vmem:[#allocation2 + $0xb0] sm:$0xff] }
  0x20   :  { %v120_v57 = vadd.f32 %v119_v46, %v960_v17  ;;  %v267_v4 = vadd.f32 %v266_v54, %v190_v29  ;;  %v98_v28 = vadd.f32 %v97_v6, %v1033_v58  ;;  %v187_v29 = vmul.f32 %v1015_v49, %v1015_v49  ;;  %1732 = vst [vmem:[#allocation19_spill] sm:$0xff] %v1067_v31  ;;  %v1080_v55 = vld [vmem:[#allocation2 + $0x158] sm:$0xff]  ;;  %v1083_v60 = vld [vmem:[#allocation2 + $0xc0] sm:$0xff] }
  0x21   :  { %v189_v30 = vmul.f32 %v1033_v58, %v1033_v58  ;;  %v191_v37 = vmul.f32 %v1047_v5, %v1047_v5  ;;  %v243_v38 = vadd.f32 %v242_v18, %v183_v59  ;;  %1733 = vst [vmem:[#allocation20_spill] sm:$0xff] %v1073_v43  ;;  %v193_v50 = vmul.f32 %v1053_v11, %v1053_v11 }
  0x22   :  { %v121_v9 = vadd.f32 %v120_v57, %v968_v22  ;;  %v268_v21 = vadd.f32 %v267_v4, %v192_v35  ;;  %v158_v35 = vadd.f32 %v157_v19, %v1050_v7  ;;  %v99_v46 = vadd.f32 %v98_v28, %v1047_v5  ;;  %1734 = vst [vmem:[#allocation21_spill] sm:$0xff] %v1080_v55 }
  0x23   :  { %v195_v54 = vmul.f32 %v1055_v12, %v1055_v12  ;;  %v1087_v59 = vmul.f32 %v1060_v24, %v1060_v24  ;;  %v210_v18 = vmul.f32 %v1004_v44, %v1004_v44  ;;  %v212_v19 = vmul.f32 %v1019_v51, %v1019_v51  ;;  %v1112_v51 = vld [vmem:[#allocation2 + $0x178] sm:$0xff] }
  0x24   :  { %v122_v34 = vadd.f32 %v121_v9, %v970_v23  ;;  %v269_v42 = vadd.f32 %v268_v21, %v194_v40  ;;  %v244_v40 = vadd.f32 %v243_v38, %v185_v14  ;;  %v159_v61 = vadd.f32 %v158_v35, %v1067_v31  ;;  %v1091_v9 = vld [vmem:[#allocation2 + $0x168] sm:$0xff]  ;;  %v1105_v38 = vld [vmem:[#allocation2 + $0x110] sm:$0xff]  ;;  %1738 = vst [vmem:[#allocation25_spill] sm:$0xff] %v1112_v51 }
  0x25   :  { %v100_v6 = vadd.f32 %v99_v46, %v1053_v11  ;;  %1735 = vst [vmem:[#allocation22_spill] sm:$0xff] %v1091_v9  ;;  %v1100_v28 = vmul.f32 %v1073_v43, %v1073_v43  ;;  %1737 = vst [vmem:[#allocation24_spill] sm:$0xff] %v1105_v38  ;;  %v1110_v46 = vmul.f32 %v1083_v60, %v1083_v60 }
  0x26   :  { %v123_v57 = vadd.f32 %v122_v34, %v975_v26  ;;  %v270_v4 = vadd.f32 %v269_v42, %v196_v41  ;;  %v245_v14 = vadd.f32 %v244_v40, %v187_v29  ;;  %v160_v34 = vadd.f32 %v159_v61, %v1080_v55  ;;  %v1103_v41 = vld [vmem:[#allocation2 + $0x100] sm:$0xff] }
  0x27   :  { %1736 = vst [vmem:[#allocation23_spill] sm:$0xff] %v1103_v41  ;;  %v101_v42 = vadd.f32 %v100_v6, %v1055_v12  ;;  %v216_v44 = vmul.f32 %v1050_v7, %v1050_v7  ;;  %v1124_v12 = vld [vmem:[#allocation2 + $0x188] sm:$0xff]  ;;  %v1132_v7 = vld [vmem:[#allocation2 + $0x130] sm:$0xff] }
  0x28   :  { %v124_v21 = vadd.f32 %v123_v57, %v977_v27  ;;  %v271_v35 = vadd.f32 %v270_v4, %v198_v47  ;;  %v214_v57 = vmul.f32 %v1030_v56, %v1030_v56  ;;  %v246_v40 = vadd.f32 %v245_v14, %v189_v30  ;;  %v1120_v47 = vld [vmem:[#allocation2 + $0x120] sm:$0xff]  ;;  %1739 = vst [vmem:[#allocation26_spill] sm:$0xff] %v1124_v12 }
  0x29   :  { %v161_v61 = vadd.f32 %v160_v34, %v1091_v9  ;;  %v102_v6 = vadd.f32 %v101_v42, %v1060_v24  ;;  %v304_v27 = vadd.f32 %v212_v19, %v210_v18  ;;  %v135_v56 = vadd.f32 %v1105_v38, %v1103_v41  ;;  %v1136_v42 = vld [vmem:[#allocation2 + $0x198] sm:$0xff] }
  0x2a   :  { %v125_v29 = vadd.f32 %v124_v21, %v984_v32  ;;  %v272_v4 = vadd.f32 %v271_v35, %v1013_v48  ;;  %v247_v30 = vadd.f32 %v246_v40, %v191_v37  ;;  %v218_v34 = vmul.f32 %v1067_v31, %v1067_v31  ;;  %1740 = vst [vmem:[#allocation27_spill] sm:$0xff] %v1136_v42  ;;  %v1145_v31 = vld [vmem:[#allocation2 + $0x140] sm:$0xff] }
  0x2b   :  { %v162_v14 = vadd.f32 %v161_v61, %v1112_v51  ;;  %v103_v35 = vadd.f32 %v102_v6, %v1073_v43  ;;  %v305_v18 = vadd.f32 %v304_v27, %v214_v57  ;;  %v136_v19 = vadd.f32 %v135_v56, %v1120_v47  ;;  %v1149_v6 = vld [vmem:[#allocation2 + $0x1a8] sm:$0xff] }
  0x2c   :  { %v126_v21 = vadd.f32 %v125_v29, %v986_v33  ;;  %v273_v48 = vadd.f32 %v272_v4, %v1023_v52  ;;  %v1140_v29 = vld [vmem:[#allocation2 + $0xd0] sm:$0xff]  ;;  %v248_v37 = vadd.f32 %v247_v30, %v193_v50  ;;  %v220_v61 = vmul.f32 %v1080_v55, %v1080_v55  ;;  %1742 = vst [vmem:[#allocation29_spill] sm:$0xff] %v1149_v6 }
  0x2d   :  { %1741 = vst [vmem:[#allocation28_spill] sm:$0xff] %v1140_v29  ;;  %v163_v40 = vadd.f32 %v162_v14, %v1124_v12  ;;  %v104_v4 = vadd.f32 %v103_v35, %v1083_v60  ;;  %v306_v27 = vadd.f32 %v305_v18, %v216_v44  ;;  %v137_v56 = vadd.f32 %v136_v19, %v1132_v7  ;;  %v1158_v55 = vld [vmem:[#allocation2 + $0x150] sm:$0xff]  ;;  %v1162_v35 = vld [vmem:[#allocation2 + $0x1b8] sm:$0xff] }
  0x2e   :  { %v127_v24 = vadd.f32 %v126_v21, %v997_v39  ;;  %v274_v52 = vadd.f32 %v273_v48, %v1027_v53  ;;  %v1153_v21 = vld [vmem:[#allocation2 + $0xe0] sm:$0xff]  ;;  %v249_v50 = vadd.f32 %v248_v37, %v195_v54  ;;  %v222_v14 = vmul.f32 %v1091_v9, %v1091_v9  ;;  %1743 = vst [vmem:[#allocation30_spill] sm:$0xff] %v1162_v35  ;;  %v1165_v19 = vld [vmem:[#allocation2 + $0xf0] sm:$0xff] }
  0x2f   :  { %v164_v30 = vadd.f32 %v163_v40, %v1136_v42  ;;  %v105_v48 = vadd.f32 %v104_v4, %v1140_v29  ;;  %v307_v44 = vadd.f32 %v306_v27, %v218_v34  ;;  %v138_v18 = vadd.f32 %v137_v56, %v1145_v31  ;;  %v1171_v9 = vld [vmem:[#allocation2 + $0x160] sm:$0xff] }
  0x30   :  { %v128_v57 = vadd.f32 %v127_v24, %v1006_v45  ;;  %v275_v53 = vadd.f32 %v274_v52, %v1041_v62  ;;  %v250_v54 = vadd.f32 %v249_v50, %v1087_v59  ;;  %v224_v40 = vmul.f32 %v1112_v51, %v1112_v51  ;;  %v1179_v50 = vld [vmem:[#allocation2 + $0x1c8] sm:$0xff] }
  0x31   :  { %v165_v37 = vadd.f32 %v164_v30, %v1149_v6  ;;  %v106_v52 = vadd.f32 %v105_v48, %v1153_v21  ;;  %v308_v4 = vadd.f32 %v307_v44, %v220_v61  ;;  %v139_v34 = vadd.f32 %v138_v18, %v1158_v55 }
  0x32   :  { %v129_v24 = vrot.slane %v128_v57, 4  ;;  %v276_v62 = vadd.f32 %v275_v53, %v1045_v63  ;;  %v203_v56 = vmul.f32 %v1140_v29, %v1140_v29  ;;  %v251_v59 = vadd.f32 %v250_v54, %v1100_v28  ;;  %v1183_v63 = vld [vmem:[#allocation2 + $0x170] sm:$0xff] }
  0x33   :  { %v166_v30 = vadd.f32 %v165_v37, %v1162_v35  ;;  %v107_v43 = vadd.f32 %v106_v52, %v1165_v19  ;;  %v309_v11 = vadd.f32 %v308_v4, %v222_v14  ;;  %v140_v61 = vadd.f32 %v139_v34, %v1171_v9  ;;  %v1194_v4 = vld [vmem:[#allocation2 + $0x1d8] sm:$0xff] }
  0x34   :  { %v130_v27 = vadd.f32 %v129_v24, %v128_v57  ;;  %v277_v51 = vrot.slane %v276_v62, 4  ;;  %v205_v57 = vmul.f32 %v1153_v21, %v1153_v21  ;;  %v252_v48 = vadd.f32 %v251_v59, %v1110_v46  ;;  %v1197_v46 = vld [vmem:[#allocation2 + $0x180] sm:$0xff] }
  0x35   :  { %v226_v28 = vmul.f32 %v1124_v12, %v1124_v12  ;;  %v108_v18 = vrot.slane %v107_v43, 4  ;;  %v167_v24 = vadd.f32 %v166_v30, %v1179_v50  ;;  %v310_v54 = vadd.f32 %v309_v11, %v224_v40 }
  0x36   :  { %v131_v53 = vrot.slane %v130_v27, 2  ;;  %v278_v44 = vadd.f32 %v277_v51, %v276_v62  ;;  %v207_v14 = vmul.f32 %v1165_v19, %v1165_v19  ;;  %v253_v52 = vadd.f32 %v252_v48, %v203_v56 }
  0x37   :  { %v141_v34 = vadd.f32 %v140_v61, %v1183_v63  ;;  %v109_v5 = vadd.f32 %v108_v18, %v107_v43  ;;  %v228_v51 = vmul.f32 %v1136_v42, %v1136_v42  ;;  %v168_v40 = vadd.f32 %v167_v24, %v1194_v4  ;;  %v1205_v18 = vld [vmem:[#allocation2 + $0x190] sm:$0xff] }
  0x38   :  { %v132_v37 = vadd.f32 %v131_v53, %v130_v27  ;;  %v279_v26 = vrot.slane %v278_v44, 2  ;;  %v254_v12 = vadd.f32 %v253_v52, %v205_v57  ;;  %v311_v27 = vadd.f32 %v310_v54, %v226_v28  ;;  %v1202_v53 = vld [vmem:[#allocation2 + $0x1e8] sm:$0xff] }
  0x39   :  { %v110_v11 = vrot.slane %v109_v5, 2  ;;  %v142_v61 = vadd.f32 %v141_v34, %v1197_v46  ;;  %v169_v28 = vadd.f32 %v168_v40, %v1202_v53  ;;  %v232_v40 = vmul.f32 %v1162_v35, %v1162_v35  ;;  %v1258_v35 = vld [vmem:[#allocation2 + $0x1d0] sm:$0xff] }
  0x3a   :  { %v133_v59 = vrot.slane %v132_v37, 1  ;;  %v280_v62 = vadd.f32 %v279_v26, %v278_v44  ;;  %v255_v56 = vadd.f32 %v254_v12, %v207_v14  ;;  %v230_v26 = vmul.f32 %v1149_v6, %v1149_v6  ;;  %v1225_v6 = vld [vmem:[#allocation2 + $0x1b0] sm:$0xff] }
  0x3b   :  { %v111_v43 = vadd.f32 %v110_v11, %v109_v5  ;;  %v312_v24 = vadd.f32 %v311_v27, %v228_v51  ;;  %v143_v5 = vadd.f32 %v142_v61, %v1205_v18 }
  0x3c   :  { %v134_v30 = vadd.f32 %v133_v59, %v132_v37  ;;  %v281_v48 = vrot.slane %v280_v62, 1  ;;  %v256_v57 = vrot.slane %v255_v56, 4  ;;  %v1214_v37 = vld [vmem:[#allocation2 + $0x1f8] sm:$0xff]  ;;  %v1217_v59 = vld [vmem:[#allocation2 + $0x1a0] sm:$0xff] }
  0x3d   :  { %v112_v52 = vrot.slane %v111_v43, 1  ;;  %v313_v51 = vadd.f32 %v312_v24, %v230_v26  ;;  %v238_v26 = vmul.f32 %v1202_v53, %v1202_v53 }
  0x3e   :  { %v1207_v23 = vmul.f32 0.03125, %v134_v30  ;;  %v282_v44 = vadd.f32 %v281_v48, %v280_v62  ;;  %v257_v54 = vadd.f32 %v256_v57, %v255_v56  ;;  %v170_v62 = vadd.f32 %v169_v28, %v1214_v37 }
  0x3f   :  { %v113_v34 = vadd.f32 %v112_v52, %v111_v43  ;;  %v144_v56 = vadd.f32 %v143_v5, %v1217_v59  ;;  %v234_v43 = vmul.f32 %v1179_v50, %v1179_v50  ;;  %v314_v28 = vadd.f32 %v313_v51, %v232_v40 }
  0x40   :  { %v334_v12 = vmul.f32 %v1207_v23, %v1207_v23  ;;  %v330_v14 = vmul.f32 0.03125, %v282_v44  ;;  %v258_v11 = vrot.slane %v257_v54, 2  ;;  %v236_v44 = vmul.f32 %v1194_v4, %v1194_v4 }
  0x41   :  { %v1222_v48 = vmul.f32 0.03125, %v113_v34  ;;  %v171_v52 = vrot.slane %v170_v62, 4  ;;  %v209_v5 = vmul.f32 %v1103_v41, %v1103_v41  ;;  %v211_v40 = vmul.f32 %v1105_v38, %v1105_v38 }
  0x42   :  { %v338_v30 = vsub.f32 %v330_v14, %v334_v12  ;;  %v259_v27 = vadd.f32 %v258_v11, %v257_v54  ;;  %v145_v54 = vadd.f32 %v144_v56, %v1225_v6  ;;  %v378_v56 = vsub.f32 %v997_v39, %v1207_v23 }
  0x43   :  { %v333_v12 = vmul.f32 %v1222_v48, %v1222_v48  ;;  %v379_v34 = vsub.f32 %v1165_v19, %v1222_v48  ;;  %v172_v11 = vadd.f32 %v171_v52, %v170_v62  ;;  %v315_v14 = vadd.f32 %v314_v28, %v234_v43  ;;  %v1266_v19 = vld [vmem:[#allocation2 + $0x1e0] sm:$0xff] }
  0x44   :  { %v342_v57 = vadd.f32 1e-05, %v338_v30  ;;  %v260_v61 = vrot.slane %v259_v27, 1  ;;  %v1244_v30 = vld [vmem:[#allocation2 + $0x1c0] sm:$0xff]  ;;  %v213_v62 = vmul.f32 %v1120_v47, %v1120_v47  ;;  %v283_v43 = vadd.f32 %v211_v40, %v209_v5 }
  0x45   :  { %v146_v42 = vadd.f32 %v145_v54, %v1244_v30  ;;  %v316_v39 = vadd.f32 %v315_v14, %v236_v44  ;;  %v173_v41 = vrot.slane %v172_v11, 2  ;;  %v352_v52 = vsub.f32 %v932_v1, %v1207_v23 }
  0x46   :  { %836 = vrsqrt.f32 %v342_v57  ;;  %v261_v24 = vadd.f32 %v260_v61, %v259_v27  ;;  %v377_v57 = vsub.f32 %v1153_v21, %v1222_v48  ;;  %v380_v61 = vsub.f32 %v1006_v45, %v1207_v23 }
  0x47   :  { %v240_v27 = vmul.f32 %v1214_v37, %v1214_v37  ;;  %v350_v21 = vsub.f32 %v930_v0, %v1207_v23  ;;  %v147_v45 = vadd.f32 %v146_v42, %v1258_v35  ;;  %v317_v29 = vadd.f32 %v316_v39, %v238_v26  ;;  %v1276_v42 = vld [vmem:[#allocation2 + $0x1f0] sm:$0xff] }
  0x48   :  { %v329_v51 = vmul.f32 0.03125, %v261_v24  ;;  %v174_v0 = vadd.f32 %v173_v41, %v172_v11  ;;  %v215_v26 = vmul.f32 %v1132_v7, %v1132_v7  ;;  %v284_v14 = vadd.f32 %v283_v43, %v213_v62 }
  0x49   :  { %v148_v54 = vadd.f32 %v147_v45, %v1266_v19  ;;  %v354_v1 = vsub.f32 %v934_v2, %v1207_v23 }
  0x4a   :  { %v337_v24 = vsub.f32 %v329_v51, %v333_v12  ;;  %v318_v12 = vadd.f32 %v317_v29, %v240_v27  ;;  %v175_v29 = vrot.slane %v174_v0, 1  ;;  %v349_v51 = vsub.f32 %v956_v15, %v1222_v48 }
  0x4b   :  { %v149_v40 = vadd.f32 %v148_v54, %v1276_v42  ;;  %v217_v27 = vmul.f32 %v1145_v31, %v1145_v31  ;;  %v219_v15 = vmul.f32 %v1158_v55, %v1158_v55 }
  0x4c   :  { %v341_v38 = vadd.f32 1e-05, %v337_v24  ;;  %v319_v11 = vrot.slane %v318_v12, 4  ;;  %v285_v24 = vadd.f32 %v284_v14, %v215_v26  ;;  %v176_v62 = vadd.f32 %v175_v29, %v174_v0 }
  0x4d   :  { %v353_v0 = vsub.f32 %v964_v20, %v1222_v48  ;;  %v360_v14 = vsub.f32 %v949_v10, %v1207_v23 }
  0x4e   :  { %838 = vrsqrt.f32 %v341_v38  ;;  %v320_v39 = vadd.f32 %v319_v11, %v318_v12  ;;  %v286_v54 = vadd.f32 %v285_v24, %v217_v27  ;;  %v221_v12 = vmul.f32 %v1171_v9, %v1171_v9 }
  0x4f   :  { %v1322_v11 = vmul.f32 0.03125, %v176_v62 }
  0x50   :  { %v1272_v28 = vpop.eup %836  ;;  %v287_v20 = vadd.f32 %v286_v54, %v219_v15 }
  0x51   :  { %v414_v44 = vmul.f32 %v1272_v28, %v350_v21  ;;  %v416_v38 = vmul.f32 %v1272_v28, %v352_v52  ;;  %v1284_v5 = vmul.f32 %v1272_v28, %v378_v56  ;;  %v1287_v41 = vmul.f32 %v1272_v28, %v380_v61 }
  0x52   :  { %v418_v2 = vmul.f32 %v1272_v28, %v354_v1  ;;  %v356_v56 = vsub.f32 %v936_v3, %v1207_v23  ;;  %v150_v61 = vrot.slane %v149_v40, 4  ;;  %v351_v21 = vsub.f32 %v958_v16, %v1222_v48 }
  0x53   :  { %509 = vxpose.xlu1.b32.start [1/16] %v414_v44, 128  ;;  %v321_v52 = vrot.slane %v320_v39, 2  ;;  %v358_v3 = vsub.f32 %v946_v8, %v1207_v23  ;;  %v223_v8 = vmul.f32 %v1183_v63, %v1183_v63  ;;  %v336_v62 = vmul.f32 %v1322_v11, %v1322_v11 }
  0x54   :  { %v151_v44 = vadd.f32 %v150_v61, %v149_v40  ;;  %v420_v26 = vmul.f32 %v1272_v28, %v356_v56  ;;  %v357_v56 = vsub.f32 %v991_v36, %v1222_v48  ;;  %v362_v61 = vsub.f32 %v953_v13, %v1207_v23 }
  0x55   :  { %v322_v29 = vadd.f32 %v321_v52, %v320_v39  ;;  %v422_v10 = vmul.f32 %v1272_v28, %v358_v3  ;;  %v424_v39 = vmul.f32 %v1272_v28, %v360_v14  ;;  %v406_v52 = vsub.f32 %v1179_v50, %v1322_v11 }
  0x56   :  { %v152_v40 = vrot.slane %v151_v44, 2  ;;  %v408_v36 = vsub.f32 %v1194_v4, %v1322_v11  ;;  %v412_v13 = vsub.f32 %v1214_v37, %v1322_v11  ;;  %v229_v3 = vmul.f32 %v1217_v59, %v1217_v59  ;;  %v1545_v4 = vld [vmem:[%s1695_s1] ss:$0 sm:$0xff]  ;;  %s895_s1 = smov [#allocation5]  }
  0x57   :  { %510 = vxpose.xlu1.b32.cont [2/16] %v416_v38, 128  ;;  %v323_v27 = vrot.slane %v322_v29, 1  ;;  %v231_v14 = vmul.f32 %v1225_v6, %v1225_v6  ;;  %v364_v37 = vsub.f32 %v960_v17, %v1207_v23  ;;  %v361_v17 = vsub.f32 %v1033_v58, %v1222_v48 }
  0x58   :  { %v1299_v45 = vpop.eup %838  ;;  %v153_v24 = vadd.f32 %v152_v40, %v151_v44  ;;  %v410_v44 = vsub.f32 %v1202_v53, %v1322_v11  ;;  %v426_v53 = vmul.f32 %v1272_v28, %v362_v61  ;;  %v359_v40 = vsub.f32 %v1015_v49, %v1222_v48 }
  0x59   :  { %v413_v43 = vmul.f32 %v1299_v45, %v349_v51  ;;  %v415_v16 = vmul.f32 %v1299_v45, %v351_v21  ;;  %v1315_v38 = vmul.f32 %v1299_v45, %v377_v57  ;;  %v1318_v1 = vmul.f32 %v1299_v45, %v379_v34 }
  0x5a   :  { %v355_v51 = vsub.f32 %v973_v25, %v1222_v48  ;;  %v225_v57 = vmul.f32 %v1197_v46, %v1197_v46  ;;  %v417_v34 = vmul.f32 %v1299_v45, %v353_v0  ;;  %v227_v25 = vmul.f32 %v1205_v18, %v1205_v18 }
  0x5b   :  { %511 = vxpose.xlu1.b32.cont [3/16] %v418_v2, 128  ;;  %477 = vxpose.xlu0.b32.start [1/16] %v413_v43, 128  ;;  %v288_v2 = vadd.f32 %v287_v20, %v221_v12  ;;  %v324_v21 = vadd.f32 %v323_v27, %v322_v29  ;;  %v154_v15 = vrot.slane %v153_v24, 1  ;;  %v421_v29 = vmul.f32 %v1299_v45, %v357_v56 }
  0x5c   :  { %v419_v54 = vmul.f32 %v1299_v45, %v355_v51  ;;  %v233_v20 = vmul.f32 %v1244_v30, %v1244_v30  ;;  %v366_v49 = vsub.f32 %v968_v22, %v1207_v23  ;;  %v423_v56 = vmul.f32 %v1299_v45, %v359_v40 }
  0x5d   :  { %v289_v43 = vadd.f32 %v288_v2, %v223_v8  ;;  %v155_v12 = vadd.f32 %v154_v15, %v153_v24  ;;  %v428_v24 = vmul.f32 %v1272_v28, %v364_v37  ;;  %v237_v2 = vmul.f32 %v1266_v19, %v1266_v19 }
  0x5e   :  { %v239_v22 = vmul.f32 %v1276_v42, %v1276_v42  ;;  %v430_v15 = vmul.f32 %v1272_v28, %v366_v49  ;;  %v1749_v49 = vld [vmem:[#allocation17_spill] sm:$0xff] }
  0x5f   :  { %512 = vxpose.xlu1.b32.cont [4/16] %v420_v26, 128  ;;  %478 = vxpose.xlu0.b32.cont [2/16] %v415_v16, 128  ;;  %v332_v26 = vmul.f32 0.03125, %v324_v21  ;;  %v290_v16 = vadd.f32 %v289_v43, %v225_v57  ;;  %v235_v57 = vmul.f32 %v1258_v35, %v1258_v35  ;;  %v1362_v27 = vmul.f32 0.03125, %v155_v12  ;;  %v1744_v43 = vld [vmem:[#allocation8_spill] sm:$0xff] }
  0x61   :  { %v340_v0 = vsub.f32 %v332_v26, %v336_v62  ;;  %v291_v8 = vadd.f32 %v290_v16, %v227_v25  ;;  %v405_v61 = vsub.f32 %v1244_v30, %v1362_v27  ;;  %v407_v25 = vsub.f32 %v1258_v35, %v1362_v27  ;;  %v1550_v30 = vld [vmem:[%s1696_s2] ss:$0 sm:$0xff]  ;;  %s816_s2 = sshll.u32 %s895_s1, 4  ;;  %s817_s2 = int_to_ptr.vmem [resolvable:$true] %s816_s2 }
  0x62   :  { %v409_v58 = vsub.f32 %v1266_v19, %v1362_v27  ;;  %v411_v21 = vsub.f32 %v1276_v42, %v1362_v27  ;;  %v425_v26 = vmul.f32 %v1299_v45, %v361_v17  ;;  %v1762_v19 = vld [vmem:[#allocation24_spill] sm:$0xff]  ;;  %v1763_v42 = vld [vmem:[#allocation19_spill] sm:$0xff]  ;;  %s866_s29 = scalar_lea.vmem %s817_s2, 8192  ;;  %p871_p9 = scmp.lt.s32.totalorder %s817_s2, %s817_s2 }
  0x63   :  { %513 = vxpose.xlu1.b32.cont [5/16] %v422_v10, 128  ;;  %479 = vxpose.xlu0.b32.cont [3/16] %v417_v34, 128  ;;  %v292_v51 = vadd.f32 %v291_v8, %v229_v3  ;;  %v344_v10 = vadd.f32 1e-05, %v340_v0  ;;  %v1745_v3 = vld [vmem:[#allocation14_spill] sm:$0xff]  ;;  %v1746_v8 = vld [vmem:[#allocation9_spill] sm:$0xff]  ;;  %p867_p8 = scmp.ne.s32.totalorder %s817_s2, %s866_s29  ;;  %p872_p10 = scmp.lt.s32.totalorder %s866_s29, %s866_s29 }
  0x64   :  { %v363_v16 = vsub.f32 %v1745_v3, %v1222_v48 }
  0x65   :  { %v293_v34 = vadd.f32 %v292_v51, %v231_v14  ;;  %840 = vrsqrt.f32 %v344_v10  ;;  %p873_p11 = por %p872_p10, %p871_p9 }
  0x66   :  { %v427_v37 = vmul.f32 %v1299_v45, %v363_v16 }
  0x67   :  { %514 = vxpose.xlu1.b32.cont [6/16] %v424_v39, 128  ;;  %480 = vxpose.xlu0.b32.cont [4/16] %v419_v54, 128  ;;  %v294_v39 = vadd.f32 %v293_v34, %v233_v20  ;;  %v368_v54 = vsub.f32 %v1744_v43, %v1207_v23  ;;  %p874_p12 = pnand %p873_p11, %p867_p8 }
  0x69   :  { %v295_v62 = vadd.f32 %v294_v39, %v235_v57  ;;  %v432_v14 = vmul.f32 %v1272_v28, %v368_v54  ;;  %v1748_v57 = vld [vmem:[#allocation10_spill] sm:$0xff] }
  0x6a   :  { %v372_v34 = vsub.f32 %v1748_v57, %v1207_v23  ;;  %v1750_v54 = vld [vmem:[#allocation18_spill] sm:$0xff]  ;;  %v1755_v57 = vld [vmem:[#allocation11_spill] sm:$0xff] }
  0x6b   :  { %515 = vxpose.xlu1.b32.cont [7/16] %v426_v53, 128  ;;  %481 = vxpose.xlu0.b32.cont [5/16] %v421_v29, 128  ;;  %v296_v0 = vadd.f32 %v295_v62, %v237_v2  ;;  %v370_v53 = vsub.f32 %v1746_v8, %v1207_v23  ;;  %v1747_v29 = vld [vmem:[#allocation16_spill] sm:$0xff]  ;;  %v367_v2 = vsub.f32 %v1749_v49, %v1222_v48 }
  0x6c   :  { %v365_v40 = vsub.f32 %v1747_v29, %v1222_v48  ;;  %v1753_v29 = vsub.f32 %v986_v33, %v1207_v23 }
  0x6d   :  { %v297_v12 = vadd.f32 %v296_v0, %v239_v22  ;;  %v434_v10 = vmul.f32 %v1272_v28, %v370_v53  ;;  %v431_v43 = vmul.f32 %v1299_v45, %v367_v2  ;;  %v335_v0 = vmul.f32 %v1362_v27, %v1362_v27 }
  0x6f   :  { %516 = vxpose.xlu1.b32.cont [8/16] %v428_v24, 128  ;;  %482 = vxpose.xlu0.b32.cont [6/16] %v423_v56, 128  ;;  %v298_v20 = vrot.slane %v297_v12, 4  ;;  %v1397_v17 = vpop.eup %840  ;;  %v429_v24 = vmul.f32 %v1299_v45, %v365_v40  ;;  %v440_v40 = vmul.f32 %v1272_v28, %v1753_v29  ;;  %v389_v29 = vsub.f32 %v1145_v31, %v1362_v27 }
  0x70   :  { %v1403_v39 = vmul.f32 %v1397_v17, %v410_v44  ;;  %v1406_v22 = vmul.f32 %v1397_v17, %v412_v13  ;;  %v1751_v44 = vsub.f32 %v984_v32, %v1207_v23  ;;  %v1756_v23 = vld [vmem:[#allocation28_spill] sm:$0xff] }
  0x71   :  { %v299_v51 = vadd.f32 %v298_v20, %v297_v12  ;;  %v1757_v33 = vsub.f32 %v1756_v23, %v1222_v48  ;;  %v393_v23 = vsub.f32 %v1171_v9, %v1362_v27 }
  0x72   :  { %v438_v13 = vmul.f32 %v1272_v28, %v1751_v44  ;;  %v1764_v44 = vld [vmem:[#allocation21_spill] sm:$0xff] }
  0x73   :  { %517 = vxpose.xlu1.b32.cont [9/16] %v430_v15, 128  ;;  %483 = vxpose.xlu0.b32.cont [7/16] %v425_v26, 128  ;;  %v300_v56 = vrot.slane %v299_v51, 2  ;;  %v436_v15 = vmul.f32 %v1272_v28, %v372_v34  ;;  %v369_v26 = vsub.f32 %v1750_v54, %v1222_v48  ;;  %v382_v34 = vsub.f32 %v1755_v57, %v1322_v11  ;;  %v1767_v57 = vld [vmem:[#allocation26_spill] sm:$0xff] }
  0x74   :  { %v439_v28 = vmul.f32 %v1299_v45, %v1757_v33 }
  0x75   :  { %v301_v62 = vadd.f32 %v300_v56, %v299_v51  ;;  %v433_v12 = vmul.f32 %v1299_v45, %v369_v26  ;;  %v1754_v51 = vsub.f32 %v1083_v60, %v1222_v48  ;;  %v1758_v60 = vld [vmem:[#allocation12_spill] sm:$0xff]  ;;  %v1759_v56 = vld [vmem:[#allocation13_spill] sm:$0xff] }
  0x76   :  { %v384_v49 = vsub.f32 %v1758_v60, %v1322_v11  ;;  %v395_v60 = vsub.f32 %v1183_v63, %v1362_v27 }
  0x77   :  { %518 = vxpose.xlu1.b32.cont [10/16] %v432_v14, 128  ;;  %484 = vxpose.xlu0.b32.cont [8/16] %v427_v37, 128  ;;  %v302_v3 = vrot.slane %v301_v62, 1  ;;  %v1752_v14 = vld [vmem:[#allocation20_spill] sm:$0xff] }
  0x78   :  { %v371_v8 = vsub.f32 %v1752_v14, %v1222_v48  ;;  %v1760_v48 = vld [vmem:[#allocation23_spill] sm:$0xff]  ;;  %v387_v14 = vsub.f32 %v1132_v7, %v1362_v27 }
  0x79   :  { %v303_v16 = vadd.f32 %v302_v3, %v301_v62  ;;  %v386_v62 = vsub.f32 %v1759_v56, %v1322_v11 }
  0x7a   :  { %v435_v20 = vmul.f32 %v1299_v45, %v371_v8 }
  0x7b   :  { %519 = vxpose.xlu1.b32.cont [11/16] %v434_v10, 128  ;;  %485 = vxpose.xlu0.b32.cont [9/16] %v429_v24, 128  ;;  %v331_v53 = vmul.f32 0.03125, %v303_v16  ;;  %v437_v10 = vmul.f32 %v1299_v45, %v1754_v51  ;;  %v446_v24 = vmul.f32 %v1397_v17, %v382_v34  ;;  %v381_v45 = vsub.f32 %v1760_v48, %v1362_v27 }
  0x7c   :  { %v391_v51 = vsub.f32 %v1158_v55, %v1362_v27  ;;  %v398_v34 = vsub.f32 %v1767_v57, %v1322_v11 }
  0x7d   :  { %v339_v37 = vsub.f32 %v331_v53, %v335_v0  ;;  %v385_v0 = vsub.f32 %v1120_v47, %v1362_v27  ;;  %v1765_v53 = vld [vmem:[#allocation22_spill] sm:$0xff] }
  0x7e   :  { %v462_v33 = vmul.f32 %v1397_v17, %v398_v34 }
  0x7f   :  { %520 = vxpose.xlu1.b32.cont [12/16] %v436_v15, 128  ;;  %486 = vxpose.xlu0.b32.cont [10/16] %v431_v43, 128  ;;  %v343_v32 = vadd.f32 1e-05, %v339_v37  ;;  %v450_v43 = vmul.f32 %v1397_v17, %v386_v62  ;;  %v394_v37 = vsub.f32 %v1765_v53, %v1322_v11  ;;  %v397_v62 = vsub.f32 %v1197_v46, %v1362_v27 }
  0x80   :  { %v401_v46 = vsub.f32 %v1217_v59, %v1362_v27 }
  0x81   :  { %842 = vrsqrt.f32 %v343_v32 }
  0x83   :  { %521 = vxpose.xlu1.b32.cont [13/16] %v438_v13, 128  ;;  %487 = vxpose.xlu0.b32.cont [11/16] %v433_v12, 128  ;;  %v392_v13 = vsub.f32 %v1764_v44, %v1322_v11 }
  0x85   :  { %v456_v8 = vmul.f32 %v1397_v17, %v392_v13 }
  0x87   :  { %522 = vxpose.xlu1.b32.cont [14/16] %v440_v40, 128  ;;  %488 = vxpose.xlu0.b32.cont [12/16] %v435_v20, 128  ;;  %v458_v40 = vmul.f32 %v1397_v17, %v394_v37  ;;  %v1766_v20 = vld [vmem:[#allocation25_spill] sm:$0xff] }
  0x88   :  { %v396_v32 = vsub.f32 %v1766_v20, %v1322_v11 }
  0x8b   :  { %523 = vxpose.xlu1.b32.cont [15/16] %v1284_v5, 128  ;;  %489 = vxpose.xlu0.b32.cont [13/16] %v437_v10, 128  ;;  %v1441_v2 = vpop.eup %842  ;;  %v448_v5 = vmul.f32 %v1397_v17, %v384_v49  ;;  %v460_v10 = vmul.f32 %v1397_v17, %v396_v32 }
  0x8c   :  { %v1459_v15 = vmul.f32 %v1441_v2, %v411_v21  ;;  %v445_v26 = vmul.f32 %v1441_v2, %v381_v45  ;;  %v390_v21 = vsub.f32 %v1763_v42, %v1322_v11  ;;  %v449_v12 = vmul.f32 %v1441_v2, %v385_v0  ;;  %v1770_v45 = vld [vmem:[#allocation30_spill] sm:$0xff] }
  0x8d   :  { %v451_v47 = vmul.f32 %v1441_v2, %v387_v14  ;;  %v453_v7 = vmul.f32 %v1441_v2, %v389_v29  ;;  %v455_v31 = vmul.f32 %v1441_v2, %v391_v51  ;;  %v457_v55 = vmul.f32 %v1441_v2, %v393_v23 }
  0x8e   :  { %v459_v9 = vmul.f32 %v1441_v2, %v395_v60  ;;  %v461_v63 = vmul.f32 %v1441_v2, %v397_v62  ;;  %v469_v50 = vmul.f32 %v1441_v2, %v405_v61 }
  0x8f   :  { %524 = vxpose.xlu1.b32.end [16/16] %v1287_v41, 128  ;;  %490 = vxpose.xlu0.b32.cont [14/16] %v439_v28, 128  ;;  %v1453_v41 = vmul.f32 %v1441_v2, %v409_v58  ;;  %v383_v58 = vsub.f32 %v1762_v19, %v1362_v27  ;;  %v1768_v28 = vld [vmem:[#allocation27_spill] sm:$0xff]  ;;  %v470_v19 = vmul.f32 %v1397_v17, %v406_v52 }
  0x91   :  { %v447_v16 = vmul.f32 %v1441_v2, %v383_v58  ;;  %v465_v58 = vmul.f32 %v1441_v2, %v401_v46 }
  0x93   :  { %573 = vxpose.xlu1.b32.start [1/16] %v446_v24, 128  ;;  %491 = vxpose.xlu0.b32.cont [15/16] %v1315_v38, 128  ;;  %v1761_v38 = vld [vmem:[#allocation15_spill] sm:$0xff]  ;;  %v400_v24 = vsub.f32 %v1768_v28, %v1322_v11 }
  0x94   :  { %v388_v54 = vsub.f32 %v1761_v38, %v1322_v11  ;;  %v399_v38 = vsub.f32 %v1205_v18, %v1362_v27  ;;  %v403_v18 = vsub.f32 %v1225_v6, %v1362_v27  ;;  %v471_v6 = vmul.f32 %v1441_v2, %v407_v25 }
  0x95   :  { %v464_v49 = vmul.f32 %v1397_v17, %v400_v24 }
  0x96   :  { %v452_v3 = vmul.f32 %v1397_v17, %v388_v54  ;;  %v467_v59 = vmul.f32 %v1441_v2, %v403_v18 }
  0x97   :  { %574 = vxpose.xlu1.b32.cont [2/16] %v448_v5, 128  ;;  %492 = vxpose.xlu0.b32.end [16/16] %v1318_v1, 128  ;;  %v454_v1 = vmul.f32 %v1397_v17, %v390_v21  ;;  %v1769_v5 = vld [vmem:[#allocation29_spill] sm:$0xff] }
  0x98   :  { %v402_v56 = vsub.f32 %v1769_v5, %v1322_v11 }
  0x9a   :  { %v466_v48 = vmul.f32 %v1397_v17, %v402_v56 }
  0x9b   :  { %575 = vxpose.xlu1.b32.cont [3/16] %v450_v43, 128  ;;  %541 = vxpose.xlu0.b32.start [1/16] %v445_v26, 128  ;;  %v404_v43 = vsub.f32 %v1770_v45, %v1322_v11  ;;  %v463_v26 = vmul.f32 %v1441_v2, %v399_v38 }
  0x9d   :  { %v468_v54 = vmul.f32 %v1397_v17, %v404_v43 }
  0x9f   :  { %576 = vxpose.xlu1.b32.cont [4/16] %v452_v3, 128  ;;  %542 = vxpose.xlu0.b32.cont [2/16] %v447_v16, 128  ;;  %v472_v3 = vmul.f32 %v1397_v17, %v408_v36 }
  0xa3   :  { %577 = vxpose.xlu1.b32.cont [5/16] %v454_v1, 128  ;;  %543 = vxpose.xlu0.b32.cont [3/16] %v449_v12, 128 }
  0xa7   :  { %578 = vxpose.xlu1.b32.cont [6/16] %v456_v8, 128  ;;  %544 = vxpose.xlu0.b32.cont [4/16] %v451_v47, 128 }
  0xab   :  { %579 = vxpose.xlu1.b32.cont [7/16] %v458_v40, 128  ;;  %545 = vxpose.xlu0.b32.cont [5/16] %v453_v7, 128 }
  0xaf   :  { %580 = vxpose.xlu1.b32.cont [8/16] %v460_v10, 128  ;;  %546 = vxpose.xlu0.b32.cont [6/16] %v455_v31, 128 }
  0xb3   :  { %581 = vxpose.xlu1.b32.cont [9/16] %v462_v33, 128  ;;  %547 = vxpose.xlu0.b32.cont [7/16] %v457_v55, 128 }
  0xb7   :  { %582 = vxpose.xlu1.b32.cont [10/16] %v464_v49, 128  ;;  %548 = vxpose.xlu0.b32.cont [8/16] %v459_v9, 128 }
  0xbb   :  { %583 = vxpose.xlu1.b32.cont [11/16] %v466_v48, 128  ;;  %549 = vxpose.xlu0.b32.cont [9/16] %v461_v63, 128 }
  0xbf   :  { %584 = vxpose.xlu1.b32.cont [12/16] %v468_v54, 128  ;;  %550 = vxpose.xlu0.b32.cont [10/16] %v463_v26, 128 }
  0xc3   :  { %585 = vxpose.xlu1.b32.cont [13/16] %v470_v19, 128  ;;  %551 = vxpose.xlu0.b32.cont [11/16] %v465_v58, 128 }
  0xc7   :  { %586 = vxpose.xlu1.b32.cont [14/16] %v472_v3, 128  ;;  %552 = vxpose.xlu0.b32.cont [12/16] %v467_v59, 128 }
  0xcb   :  { %587 = vxpose.xlu1.b32.cont [15/16] %v1403_v39, 128  ;;  %553 = vxpose.xlu0.b32.cont [13/16] %v469_v50, 128 }
  0xcf   :  { %588 = vxpose.xlu1.b32.end [16/16] %v1406_v22, 128  ;;  %554 = vxpose.xlu0.b32.cont [14/16] %v471_v6, 128 }
  0xd3   :  { %v525_v11 = vpop.trf.xlu1  ;;  %555 = vxpose.xlu0.b32.cont [15/16] %v1453_v41, 128 }
  0xd4   :  { %v628_v35 = vmul.f32 %v1545_v4, %v525_v11 }
  0xd6   :  { %v699_v52 = vadd.f32 %v1550_v30, %v628_v35 }
  0xd7   :  { %v526_v36 = vpop.trf.xlu1  ;;  %556 = vxpose.xlu0.b32.end [16/16] %v1459_v15, 128 }
  0xd8   :  { %763 = vst [vmem:[#allocation5 + $0x80] sm:$0xff] %v699_v52  ;;  %v629_v27 = vmul.f32 %v1545_v4, %v526_v36 }
  0xda   :  { %v700_v61 = vadd.f32 %v1550_v30, %v629_v27 }
  0xdb   :  { %v527_v25 = vpop.trf.xlu1  ;;  %v493_v17 = vpop.trf.xlu0 }
  0xdc   :  { %764 = vst [vmem:[#allocation5 + $0x88] sm:$0xff] %v700_v61  ;;  %v630_v39 = vmul.f32 %v1545_v4, %v527_v25  ;;  %v612_v22 = vmul.f32 %v1545_v4, %v493_v17 }
  0xde   :  { %v701_v2 = vadd.f32 %v1550_v30, %v630_v39  ;;  %v683_v41 = vadd.f32 %v1550_v30, %v612_v22 }
  0xdf   :  { %v528_v42 = vpop.trf.xlu1  ;;  %v494_v21 = vpop.trf.xlu0 }
  0xe0   :  { %765 = vst [vmem:[#allocation5 + $0x90] sm:$0xff] %v701_v2  ;;  %v631_v15 = vmul.f32 %v1545_v4, %v528_v42  ;;  %747 = vst [vmem:[#allocation5] sm:$0xff] %v683_v41  ;;  %v613_v16 = vmul.f32 %v1545_v4, %v494_v21 }
  0xe2   :  { %v702_v0 = vadd.f32 %v1550_v30, %v631_v15  ;;  %v684_v1 = vadd.f32 %v1550_v30, %v613_v16 }
  0xe3   :  { %v529_v44 = vpop.trf.xlu1  ;;  %v495_v13 = vpop.trf.xlu0 }
  0xe4   :  { %766 = vst [vmem:[#allocation5 + $0x98] sm:$0xff] %v702_v0  ;;  %v632_v12 = vmul.f32 %v1545_v4, %v529_v44  ;;  %748 = vst [vmem:[#allocation5 + $0x8] sm:$0xff] %v684_v1  ;;  %v614_v14 = vmul.f32 %v1545_v4, %v495_v13 }
  0xe6   :  { %v703_v8 = vadd.f32 %v1550_v30, %v632_v12  ;;  %v685_v53 = vadd.f32 %v1550_v30, %v614_v14 }
  0xe7   :  { %v530_v37 = vpop.trf.xlu1  ;;  %v496_v47 = vpop.trf.xlu0 }
  0xe8   :  { %767 = vst [vmem:[#allocation5 + $0xa0] sm:$0xff] %v703_v8  ;;  %v633_v29 = vmul.f32 %v1545_v4, %v530_v37  ;;  %749 = vst [vmem:[#allocation5 + $0x10] sm:$0xff] %v685_v53  ;;  %v615_v40 = vmul.f32 %v1545_v4, %v496_v47 }
  0xea   :  { %v704_v20 = vadd.f32 %v1550_v30, %v633_v29  ;;  %v686_v32 = vadd.f32 %v1550_v30, %v615_v40 }
  0xeb   :  { %v531_v7 = vpop.trf.xlu1  ;;  %v497_v51 = vpop.trf.xlu0 }
  0xec   :  { %768 = vst [vmem:[#allocation5 + $0xa8] sm:$0xff] %v704_v20  ;;  %v634_v10 = vmul.f32 %v1545_v4, %v531_v7  ;;  %750 = vst [vmem:[#allocation5 + $0x18] sm:$0xff] %v686_v32  ;;  %v616_v57 = vmul.f32 %v1545_v4, %v497_v51 }
  0xee   :  { %v705_v34 = vadd.f32 %v1550_v30, %v634_v10  ;;  %v687_v31 = vadd.f32 %v1550_v30, %v616_v57 }
  0xef   :  { %v532_v23 = vpop.trf.xlu1  ;;  %v498_v33 = vpop.trf.xlu0 }
  0xf0   :  { %769 = vst [vmem:[#allocation5 + $0xb0] sm:$0xff] %v705_v34  ;;  %v635_v28 = vmul.f32 %v1545_v4, %v532_v23  ;;  %751 = vst [vmem:[#allocation5 + $0x20] sm:$0xff] %v687_v31  ;;  %v617_v24 = vmul.f32 %v1545_v4, %v498_v33 }
  0xf2   :  { %v706_v55 = vadd.f32 %v1550_v30, %v635_v28  ;;  %v688_v60 = vadd.f32 %v1550_v30, %v617_v24 }
  0xf3   :  { %v533_v49 = vpop.trf.xlu1  ;;  %v499_v5 = vpop.trf.xlu0 }
  0xf4   :  { %770 = vst [vmem:[#allocation5 + $0xb8] sm:$0xff] %v706_v55  ;;  %v636_v56 = vmul.f32 %v1545_v4, %v533_v49  ;;  %752 = vst [vmem:[#allocation5 + $0x28] sm:$0xff] %v688_v60  ;;  %v618_v9 = vmul.f32 %v1545_v4, %v499_v5 }
  0xf6   :  { %v707_v62 = vadd.f32 %v1550_v30, %v636_v56  ;;  %v689_v48 = vadd.f32 %v1550_v30, %v618_v9 }
  0xf7   :  { %v534_v45 = vpop.trf.xlu1  ;;  %v500_v43 = vpop.trf.xlu0 }
  0xf8   :  { %771 = vst [vmem:[#allocation5 + $0xc0] sm:$0xff] %v707_v62  ;;  %v637_v63 = vmul.f32 %v1545_v4, %v534_v45  ;;  %753 = vst [vmem:[#allocation5 + $0x30] sm:$0xff] %v689_v48  ;;  %v619_v38 = vmul.f32 %v1545_v4, %v500_v43 }
  0xfa   :  { %v708_v54 = vadd.f32 %v1550_v30, %v637_v63  ;;  %v690_v26 = vadd.f32 %v1550_v30, %v619_v38 }
  0xfb   :  { %v535_v46 = vpop.trf.xlu1  ;;  %v501_v19 = vpop.trf.xlu0 }
  0xfc   :  { %772 = vst [vmem:[#allocation5 + $0xc8] sm:$0xff] %v708_v54  ;;  %v638_v58 = vmul.f32 %v1545_v4, %v535_v46  ;;  %754 = vst [vmem:[#allocation5 + $0x38] sm:$0xff] %v690_v26  ;;  %v620_v18 = vmul.f32 %v1545_v4, %v501_v19 }
  0xfe   :  { %v709_v3 = vadd.f32 %v1550_v30, %v638_v58  ;;  %v691_v59 = vadd.f32 %v1550_v30, %v620_v18 }
  0xff   :  { %v536_v50 = vpop.trf.xlu1  ;;  %v502_v6 = vpop.trf.xlu0 }
 0x100   :  { %773 = vst [vmem:[#allocation5 + $0xd0] sm:$0xff] %v709_v3  ;;  %v639_v11 = vmul.f32 %v1545_v4, %v536_v50  ;;  %755 = vst [vmem:[#allocation5 + $0x40] sm:$0xff] %v691_v59  ;;  %v621_v35 = vmul.f32 %v1545_v4, %v502_v6 }
 0x102   :  { %v710_v52 = vadd.f32 %v1550_v30, %v639_v11  ;;  %v692_v36 = vadd.f32 %v1550_v30, %v621_v35 }
 0x103   :  { %v537_v27 = vpop.trf.xlu1  ;;  %v503_v61 = vpop.trf.xlu0 }
 0x104   :  { %774 = vst [vmem:[#allocation5 + $0xd8] sm:$0xff] %v710_v52  ;;  %v640_v25 = vmul.f32 %v1545_v4, %v537_v27  ;;  %756 = vst [vmem:[#allocation5 + $0x48] sm:$0xff] %v692_v36  ;;  %v622_v17 = vmul.f32 %v1545_v4, %v503_v61 }
 0x106   :  { %v711_v39 = vadd.f32 %v1550_v30, %v640_v25  ;;  %v693_v22 = vadd.f32 %v1550_v30, %v622_v17 }
 0x107   :  { %v538_v2 = vpop.trf.xlu1  ;;  %v504_v41 = vpop.trf.xlu0 }
 0x108   :  { %775 = vst [vmem:[#allocation5 + $0xe0] sm:$0xff] %v711_v39  ;;  %v641_v42 = vmul.f32 %v1545_v4, %v538_v2  ;;  %757 = vst [vmem:[#allocation5 + $0x50] sm:$0xff] %v693_v22  ;;  %v623_v21 = vmul.f32 %v1545_v4, %v504_v41 }
 0x10a   :  { %v712_v15 = vadd.f32 %v1550_v30, %v641_v42  ;;  %v694_v16 = vadd.f32 %v1550_v30, %v623_v21 }
 0x10b   :  { %v539_v0 = vpop.trf.xlu1  ;;  %v505_v1 = vpop.trf.xlu0 }
 0x10c   :  { %776 = vst [vmem:[#allocation5 + $0xe8] sm:$0xff] %v712_v15  ;;  %v642_v44 = vmul.f32 %v1545_v4, %v539_v0  ;;  %758 = vst [vmem:[#allocation5 + $0x58] sm:$0xff] %v694_v16  ;;  %v624_v13 = vmul.f32 %v1545_v4, %v505_v1 }
 0x10e   :  { %v713_v12 = vadd.f32 %v1550_v30, %v642_v44  ;;  %v695_v14 = vadd.f32 %v1550_v30, %v624_v13 }
 0x10f   :  { %v540_v8 = vpop.trf.xlu1  ;;  %v506_v53 = vpop.trf.xlu0 }
 0x110   :  { %777 = vst [vmem:[#allocation5 + $0xf0] sm:$0xff] %v713_v12  ;;  %v643_v37 = vmul.f32 %v1545_v4, %v540_v8  ;;  %759 = vst [vmem:[#allocation5 + $0x60] sm:$0xff] %v695_v14  ;;  %v625_v47 = vmul.f32 %v1545_v4, %v506_v53 }
 0x112   :  { %v714_v29 = vadd.f32 %v1550_v30, %v643_v37  ;;  %v696_v40 = vadd.f32 %v1550_v30, %v625_v47 }
 0x113   :  { %v589_v20 = vpop.trf.xlu1  ;;  %v507_v32 = vpop.trf.xlu0 }
 0x114   :  { %778 = vst [vmem:[#allocation5 + $0xf8] sm:$0xff] %v714_v29  ;;  %v660_v7 = vmul.f32 %v1545_v4, %v589_v20  ;;  %760 = vst [vmem:[#allocation5 + $0x68] sm:$0xff] %v696_v40  ;;  %v626_v51 = vmul.f32 %v1545_v4, %v507_v32 }
 0x116   :  { %v731_v10 = vadd.f32 %v1550_v30, %v660_v7  ;;  %v697_v57 = vadd.f32 %v1550_v30, %v626_v51 }
 0x117   :  { %v590_v34 = vpop.trf.xlu1  ;;  %v508_v31 = vpop.trf.xlu0 }
 0x118   :  { %795 = vst [vmem:[#allocation5 + $0x180] sm:$0xff] %v731_v10  ;;  %v661_v23 = vmul.f32 %v1545_v4, %v590_v34  ;;  %761 = vst [vmem:[#allocation5 + $0x70] sm:$0xff] %v697_v57  ;;  %v627_v33 = vmul.f32 %v1545_v4, %v508_v31 }
 0x11a   :  { %v732_v28 = vadd.f32 %v1550_v30, %v661_v23  ;;  %v698_v24 = vadd.f32 %v1550_v30, %v627_v33 }
 0x11b   :  { %v591_v55 = vpop.trf.xlu1  ;;  %v557_v60 = vpop.trf.xlu0 }
 0x11c   :  { %796 = vst [vmem:[#allocation5 + $0x188] sm:$0xff] %v732_v28  ;;  %v662_v49 = vmul.f32 %v1545_v4, %v591_v55  ;;  %762 = vst [vmem:[#allocation5 + $0x78] sm:$0xff] %v698_v24  ;;  %v644_v5 = vmul.f32 %v1545_v4, %v557_v60 }
 0x11e   :  { %v733_v56 = vadd.f32 %v1550_v30, %v662_v49  ;;  %v715_v9 = vadd.f32 %v1550_v30, %v644_v5 }
 0x11f   :  { %v592_v62 = vpop.trf.xlu1  ;;  %v558_v48 = vpop.trf.xlu0 }
 0x120   :  { %797 = vst [vmem:[#allocation5 + $0x190] sm:$0xff] %v733_v56  ;;  %v663_v45 = vmul.f32 %v1545_v4, %v592_v62  ;;  %779 = vst [vmem:[#allocation5 + $0x100] sm:$0xff] %v715_v9  ;;  %v645_v43 = vmul.f32 %v1545_v4, %v558_v48 }
 0x122   :  { %v734_v63 = vadd.f32 %v1550_v30, %v663_v45  ;;  %v716_v38 = vadd.f32 %v1550_v30, %v645_v43 }
 0x123   :  { %v593_v54 = vpop.trf.xlu1  ;;  %v559_v26 = vpop.trf.xlu0 }
 0x124   :  { %798 = vst [vmem:[#allocation5 + $0x198] sm:$0xff] %v734_v63  ;;  %v664_v46 = vmul.f32 %v1545_v4, %v593_v54  ;;  %780 = vst [vmem:[#allocation5 + $0x108] sm:$0xff] %v716_v38  ;;  %v646_v19 = vmul.f32 %v1545_v4, %v559_v26 }
 0x126   :  { %v735_v58 = vadd.f32 %v1550_v30, %v664_v46  ;;  %v717_v18 = vadd.f32 %v1550_v30, %v646_v19 }
 0x127   :  { %v594_v3 = vpop.trf.xlu1  ;;  %v560_v59 = vpop.trf.xlu0 }
 0x128   :  { %799 = vst [vmem:[#allocation5 + $0x1a0] sm:$0xff] %v735_v58  ;;  %v665_v50 = vmul.f32 %v1545_v4, %v594_v3  ;;  %781 = vst [vmem:[#allocation5 + $0x110] sm:$0xff] %v717_v18  ;;  %v647_v6 = vmul.f32 %v1545_v4, %v560_v59 }
 0x12a   :  { %v736_v11 = vadd.f32 %v1550_v30, %v665_v50  ;;  %v718_v35 = vadd.f32 %v1550_v30, %v647_v6 }
 0x12b   :  { %v595_v52 = vpop.trf.xlu1  ;;  %v561_v36 = vpop.trf.xlu0 }
 0x12c   :  { %800 = vst [vmem:[#allocation5 + $0x1a8] sm:$0xff] %v736_v11  ;;  %v666_v27 = vmul.f32 %v1545_v4, %v595_v52  ;;  %782 = vst [vmem:[#allocation5 + $0x118] sm:$0xff] %v718_v35  ;;  %v648_v61 = vmul.f32 %v1545_v4, %v561_v36 }
 0x12e   :  { %v737_v25 = vadd.f32 %v1550_v30, %v666_v27  ;;  %v719_v17 = vadd.f32 %v1550_v30, %v648_v61 }
 0x12f   :  { %v596_v39 = vpop.trf.xlu1  ;;  %v562_v22 = vpop.trf.xlu0 }
 0x130   :  { %801 = vst [vmem:[#allocation5 + $0x1b0] sm:$0xff] %v737_v25  ;;  %v667_v2 = vmul.f32 %v1545_v4, %v596_v39  ;;  %783 = vst [vmem:[#allocation5 + $0x120] sm:$0xff] %v719_v17  ;;  %v649_v41 = vmul.f32 %v1545_v4, %v562_v22 }
 0x132   :  { %v738_v42 = vadd.f32 %v1550_v30, %v667_v2  ;;  %v720_v21 = vadd.f32 %v1550_v30, %v649_v41 }
 0x133   :  { %v597_v15 = vpop.trf.xlu1  ;;  %v563_v16 = vpop.trf.xlu0 }
 0x134   :  { %802 = vst [vmem:[#allocation5 + $0x1b8] sm:$0xff] %v738_v42  ;;  %v668_v0 = vmul.f32 %v1545_v4, %v597_v15  ;;  %784 = vst [vmem:[#allocation5 + $0x128] sm:$0xff] %v720_v21  ;;  %v650_v1 = vmul.f32 %v1545_v4, %v563_v16 }
 0x136   :  { %v739_v44 = vadd.f32 %v1550_v30, %v668_v0  ;;  %v721_v13 = vadd.f32 %v1550_v30, %v650_v1 }
 0x137   :  { %v598_v12 = vpop.trf.xlu1  ;;  %v564_v14 = vpop.trf.xlu0 }
 0x138   :  { %803 = vst [vmem:[#allocation5 + $0x1c0] sm:$0xff] %v739_v44  ;;  %v669_v8 = vmul.f32 %v1545_v4, %v598_v12  ;;  %785 = vst [vmem:[#allocation5 + $0x130] sm:$0xff] %v721_v13  ;;  %v651_v53 = vmul.f32 %v1545_v4, %v564_v14 }
 0x13a   :  { %v740_v37 = vadd.f32 %v1550_v30, %v669_v8  ;;  %v722_v47 = vadd.f32 %v1550_v30, %v651_v53 }
 0x13b   :  { %v599_v29 = vpop.trf.xlu1  ;;  %v565_v40 = vpop.trf.xlu0 }
 0x13c   :  { %804 = vst [vmem:[#allocation5 + $0x1c8] sm:$0xff] %v740_v37  ;;  %v670_v20 = vmul.f32 %v1545_v4, %v599_v29  ;;  %786 = vst [vmem:[#allocation5 + $0x138] sm:$0xff] %v722_v47  ;;  %v652_v32 = vmul.f32 %v1545_v4, %v565_v40 }
 0x13e   :  { %v741_v7 = vadd.f32 %v1550_v30, %v670_v20  ;;  %v723_v51 = vadd.f32 %v1550_v30, %v652_v32 }
 0x13f   :  { %v600_v10 = vpop.trf.xlu1  ;;  %v566_v57 = vpop.trf.xlu0 }
 0x140   :  { %805 = vst [vmem:[#allocation5 + $0x1d0] sm:$0xff] %v741_v7  ;;  %v671_v34 = vmul.f32 %v1545_v4, %v600_v10  ;;  %787 = vst [vmem:[#allocation5 + $0x140] sm:$0xff] %v723_v51  ;;  %v653_v31 = vmul.f32 %v1545_v4, %v566_v57 }
 0x142   :  { %v742_v23 = vadd.f32 %v1550_v30, %v671_v34  ;;  %v724_v33 = vadd.f32 %v1550_v30, %v653_v31 }
 0x143   :  { %v601_v28 = vpop.trf.xlu1  ;;  %v567_v24 = vpop.trf.xlu0 }
 0x144   :  { %806 = vst [vmem:[#allocation5 + $0x1d8] sm:$0xff] %v742_v23  ;;  %v672_v55 = vmul.f32 %v1545_v4, %v601_v28  ;;  %788 = vst [vmem:[#allocation5 + $0x148] sm:$0xff] %v724_v33  ;;  %v654_v60 = vmul.f32 %v1545_v4, %v567_v24 }
 0x146   :  { %v743_v49 = vadd.f32 %v1550_v30, %v672_v55  ;;  %v725_v5 = vadd.f32 %v1550_v30, %v654_v60 }
 0x147   :  { %v602_v56 = vpop.trf.xlu1  ;;  %v568_v9 = vpop.trf.xlu0 }
 0x148   :  { %807 = vst [vmem:[#allocation5 + $0x1e0] sm:$0xff] %v743_v49  ;;  %v673_v62 = vmul.f32 %v1545_v4, %v602_v56  ;;  %789 = vst [vmem:[#allocation5 + $0x150] sm:$0xff] %v725_v5  ;;  %v655_v48 = vmul.f32 %v1545_v4, %v568_v9 }
 0x14a   :  { %v744_v45 = vadd.f32 %v1550_v30, %v673_v62  ;;  %v726_v43 = vadd.f32 %v1550_v30, %v655_v48 }
 0x14b   :  { %v603_v63 = vpop.trf.xlu1  ;;  %v569_v38 = vpop.trf.xlu0 }
 0x14c   :  { %808 = vst [vmem:[#allocation5 + $0x1e8] sm:$0xff] %v744_v45  ;;  %v674_v54 = vmul.f32 %v1545_v4, %v603_v63  ;;  %790 = vst [vmem:[#allocation5 + $0x158] sm:$0xff] %v726_v43  ;;  %v656_v26 = vmul.f32 %v1545_v4, %v569_v38 }
 0x14e   :  { %v745_v46 = vadd.f32 %v1550_v30, %v674_v54  ;;  %v727_v19 = vadd.f32 %v1550_v30, %v656_v26 }
 0x14f   :  { %v604_v58 = vpop.trf.xlu1  ;;  %v570_v18 = vpop.trf.xlu0 }
 0x150   :  { %809 = vst [vmem:[#allocation5 + $0x1f0] sm:$0xff] %v745_v46  ;;  %v675_v3 = vmul.f32 %v1545_v4, %v604_v58  ;;  %791 = vst [vmem:[#allocation5 + $0x160] sm:$0xff] %v727_v19  ;;  %v657_v59 = vmul.f32 %v1545_v4, %v570_v18 }
 0x152   :  { %v746_v50 = vadd.f32 %v1550_v30, %v675_v3  ;;  %v728_v6 = vadd.f32 %v1550_v30, %v657_v59 }
 0x153   :  { %v571_v11 = vpop.trf.xlu0 }
 0x154   :  { %810 = vst [vmem:[#allocation5 + $0x1f8] sm:$0xff] %v746_v50  ;;  %792 = vst [vmem:[#allocation5 + $0x168] sm:$0xff] %v728_v6  ;;  %v658_v35 = vmul.f32 %v1545_v4, %v571_v11 }
 0x156   :  { %v729_v52 = vadd.f32 %v1550_v30, %v658_v35 }
 0x157   :  { %v572_v36 = vpop.trf.xlu0 }
 0x158   :  { %793 = vst [vmem:[#allocation5 + $0x170] sm:$0xff] %v729_v52  ;;  %v659_v27 = vmul.f32 %v1545_v4, %v572_v36 }
 0x15a   :  { %v730_v61 = vadd.f32 %v1550_v30, %v659_v27 }
 0x15c   :  { %794 = vst [vmem:[#allocation5 + $0x178] sm:$0xff] %v730_v61 }
 0x15d   :  { %877 = shalt.err (!%p874_p12)
}
 0x15e   :  { %s878_s5 = scalar_lea.hbm %s1697_s3, 8192 }
 0x15f   :  { %p879_p13 = scmp.ne.s32.totalorder %s1697_s3, %s878_s5  ;;  %p882_p0 = scmp.lt.u32.totalorder %s878_s5, %s1697_s3 }
 0x161   :  { %p884_p1 = pnand %p882_p0, %p879_p13 }
 0x163   :  { %887 = shalt.err (!%p884_p1)
}
 0x164   :  { %s896_s10 = smov 128   ;;  %s897_s11 = smov 8  }
 0x165   :  { %822 = dma.vmem_to_hbm [thread:$0]  %s817_s2, 8192, %s1697_s3, [#allocation4], %s896_s10, %s896_s10, %s897_s11  }
 0x166   :  { %890 = dma.done.wait [#allocation4], 8192  }
 0x167   :  { %891 = vsyncadd [#allocation4], 4294959104 }
 0x168   :  { %826 = vsyncpa [#allocation3], 1 }
 0x169   :  { %827 = vsyncpa [#allocation4], 1 }

</bundles_post_ra>
